<compile_context>
chip_gen: v6e
topology: v6e:2x2x1
jax: 0.10.0
libtpu: 0.0.40
codegen_flags: <defaults>
</compile_context>

<pallas_src>
import jax
import jax.numpy as jnp
from jax.experimental import pallas as pl
from jax.experimental.pallas import tpu as pltpu


_SQRT_2_OVER_PI = 0.7978845608028654
_GELU_COEFF = 0.044715


def _gelu_tanh(h):
    # BERT-style tanh-approximation GELU; tanh goes to the EUP slot.
    u = h * h
    return 0.5 * h * (1.0 + jnp.tanh(_SQRT_2_OVER_PI * h * (1.0 + _GELU_COEFF * u)))


# -----------------------------------------------------------------------------
# Kernels
# -----------------------------------------------------------------------------
def ffn_resident_kernel(x_ref, w1_ref, b1_ref, w2_ref, b2_ref, o_ref):
    """Weights fully VMEM-resident; one grid axis over row tiles, no scratch."""
    h = jnp.dot(x_ref[...], w1_ref[...], preferred_element_type=jnp.float32)
    h = h + b1_ref[...].astype(jnp.float32)
    g = _gelu_tanh(h)
    # TODO(synk): on v6e/v7x the bias+GELU polynomial could run in packed bf16;
    #             kept in f32 for accuracy parity with the reference.
    o = jnp.dot(g.astype(w2_ref.dtype), w2_ref[...],
                preferred_element_type=jnp.float32)
    o_ref[...] = (o + b2_ref[...].astype(jnp.float32)).astype(o_ref.dtype)


def ffn_streamed_kernel(x_ref, w1_ref, b1_ref, w2_ref, b2_ref, o_ref, acc_ref):
    """d_ff streamed in slabs over grid axis 1 (reduction); f32 VMEM accumulator
    seeded with bias2 at the first slab and stored at the last slab."""
    k = pl.program_id(1)

    @pl.when(k == 0)
    def _init():
        acc_ref[...] = jnp.broadcast_to(b2_ref[...].astype(jnp.float32),
                                        acc_ref.shape)

    h = jnp.dot(x_ref[...], w1_ref[...], preferred_element_type=jnp.float32)
    h = h + b1_ref[...].astype(jnp.float32)
    g = _gelu_tanh(h)
    acc_ref[...] += jnp.dot(g.astype(w2_ref.dtype), w2_ref[...],
                            preferred_element_type=jnp.float32)

    @pl.when(k == pl.num_programs(1) - 1)
    def _finalize():
        o_ref[...] = acc_ref[...].astype(o_ref.dtype)


# -----------------------------------------------------------------------------
# Tiling / budget helpers
# -----------------------------------------------------------------------------
def _cdiv(a, b):
    return (a + b - 1) // b


def _round_up(a, b):
    return ((a + b - 1) // b) * b


def _pad_axis(arr, axis, target):
    cur = arr.shape[axis]
    if cur == target:
        return arr
    pad = [(0, 0)] * arr.ndim
    pad[axis] = (0, target - cur)
    return jnp.pad(arr, pad)


def _vmem_budget_bytes():
    """~85% of physical per-core VMEM (v5e/v6e: 128 MiB, v7x: 64 MiB)."""
    try:
        cap = int(pltpu.get_tpu_info().vmem_capacity_bytes)
    except Exception:
        cap = 0
    if cap <= 0:
        cap = 64 * 1024 * 1024  # conservative fallback (v7x-sized)
    return max(32 * 1024 * 1024, int(cap * 0.85))


def _is_two_core_chip():
    """v7x has two TensorCores per chip; balance the parallel row axis there."""
    try:
        return "v7" in jax.devices()[0].device_kind.lower()
    except Exception:
        return False


def _choose_row_tiling(M, tm_cap, prefer_even):
    """Minimal-padding row tiling: num_tiles first, then tm = ceil(M/num_tiles)."""
    tm_cap = max(8, (tm_cap // 8) * 8)
    num_tiles = _cdiv(M, tm_cap)
    if prefer_even and num_tiles % 2 == 1 and (num_tiles > 1 or M >= 256):
        num_tiles += 1
    tm = _round_up(_cdiv(M, num_tiles), 8)
    return tm, num_tiles


def _resident_row_cap(budget, dmp, dfp, xb, wb, bb, ob):
    """Max rows per tile if both weights are VMEM-resident (conservative)."""
    fixed = 2 * (2 * dmp * dfp * wb + dfp * bb + dmp * bb)   # W1+W2+biases (x2 buf)
    # per row: double-buffered x/out tiles + f32 hidden + temp + cast copy of g
    per_row = 2 * dmp * xb + 2 * dmp * ob + dfp * (8 + wb)
    if fixed >= budget:
        return 0
    return ((budget - fixed) // per_row) // 8 * 8


def _streamed_tiles(budget, M, dmp, dfp, xb, wb, bb, ob, tm_max, tf_max):
    """Pick (row cap, d_ff slab) for the streamed-reduction path."""
    cands = [c for c in (dfp, 2048, 1024, 512, 256, 128)
             if c <= dfp and dfp % c == 0]
    if tf_max is not None:
        cands = [c for c in cands if c <= tf_max] or [128]
    min_rows = min(_round_up(M, 8), 128)
    for tf in cands:
        w_bytes = 2 * (dmp * tf * wb + tf * bb + tf * dmp * wb + dmp * bb)
        per_row = 2 * dmp * xb + 2 * dmp * ob + dmp * 4 + tf * (8 + wb)
        if w_bytes >= budget:
            continue
        rows = ((budget - w_bytes) // per_row) // 8 * 8
        if rows >= min_rows:
            return min(tm_max, rows), tf
    return min(tm_max, 128), 128


# -----------------------------------------------------------------------------
# Wrapper
# -----------------------------------------------------------------------------
def pointwise_ffn(x, w1, b1, w2, b2, *, use_bf16_operands=False,
                  tm_max=None, tf_max=None, force_streamed=False):
    """x: (B, S, d_model); w1: (d_model, d_ff); w2: (d_ff, d_model).
    Weights stored as (in_features, out_features) (transpose of nn.Linear)."""
    B, S, d_model = x.shape
    d_ff = w1.shape[1]
    M = B * S
    out_dtype = x.dtype

    # Optional bf16 MXU-operand path (f32 accumulation in-kernel).
    if use_bf16_operands:
        if x.dtype == jnp.float32:
            x = x.astype(jnp.bfloat16)
        if w1.dtype == jnp.float32:
            w1 = w1.astype(jnp.bfloat16)
            w2 = w2.astype(jnp.bfloat16)

    # Lane-dense feature axes: pad d_model / d_ff up to multiples of 128.
    dmp = _round_up(d_model, 128)
    dfp = _round_up(d_ff, 128)

    x2d = x.reshape(M, d_model)
    w1p, b1p, w2p, b2p = w1, b1, w2, b2
    if dmp != d_model:
        x2d = _pad_axis(x2d, 1, dmp)
        w1p = _pad_axis(w1p, 0, dmp)
        w2p = _pad_axis(w2p, 1, dmp)
        b2p = _pad_axis(b2p, 0, dmp)
    if dfp != d_ff:
        w1p = _pad_axis(w1p, 1, dfp)
        b1p = _pad_axis(b1p, 0, dfp)
        w2p = _pad_axis(w2p, 0, dfp)
    b1_2d = b1p.reshape(1, dfp)
    b2_2d = b2p.reshape(1, dmp)

    budget = _vmem_budget_bytes()
    prefer_even = _is_two_core_chip()
    if tm_max is None:
        tm_max = 1024 if budget >= 96 * 1024 * 1024 else 512

    xb = jnp.dtype(x2d.dtype).itemsize
    wb = jnp.dtype(w1p.dtype).itemsize
    bb = jnp.dtype(b1p.dtype).itemsize
    ob = jnp.dtype(out_dtype).itemsize

    cap_rows = 0 if force_streamed else _resident_row_cap(
        budget, dmp, dfp, xb, wb, bb, ob)
    use_resident = cap_rows >= min(_round_up(M, 8), 128)

    if use_resident:
        tm, num_tiles = _choose_row_tiling(M, min(tm_max, cap_rows), prefer_even)
        grid = (num_tiles,)
        in_specs = [
            pl.BlockSpec((tm, dmp), lambda i: (i, 0)),     # x rows
            pl.BlockSpec((dmp, dfp), lambda i: (0, 0)),    # W1 (resident)
            pl.BlockSpec((1, dfp), lambda i: (0, 0)),      # b1 (resident)
            pl.BlockSpec((dfp, dmp), lambda i: (0, 0)),    # W2 (resident)
            pl.BlockSpec((1, dmp), lambda i: (0, 0)),      # b2 (resident)
        ]
        out_specs = pl.BlockSpec((tm, dmp), lambda i: (i, 0))
        scratch_shapes = ()
        kernel = ffn_resident_kernel
        dim_sem = ("parallel",)
    else:
        rows_cap, tf = _streamed_tiles(budget, M, dmp, dfp, xb, wb, bb, ob,
                                       tm_max, tf_max)
        tm, num_tiles = _choose_row_tiling(M, rows_cap, prefer_even)
        grid = (num_tiles, dfp // tf)
        in_specs = [
            pl.BlockSpec((tm, dmp), lambda i, k: (i, 0)),  # x rows
            pl.BlockSpec((dmp, tf), lambda i, k: (0, k)),  # W1 d_ff slab
            pl.BlockSpec((1, tf), lambda i, k: (0, k)),    # b1 slab
            pl.BlockSpec((tf, dmp), lambda i, k: (k, 0)),  # W2 d_ff slab
            pl.BlockSpec((1, dmp), lambda i, k: (0, 0)),   # b2 (tiny)
        ]
        out_specs = pl.BlockSpec((tm, dmp), lambda i, k: (i, 0))
        scratch_shapes = (pltpu.VMEM((tm, dmp), jnp.float32),)
        kernel = ffn_streamed_kernel
        dim_sem = ("parallel", "arbitrary")

    M_pad = tm * num_tiles
    if M_pad != M:
        x2d = jnp.pad(x2d, ((0, M_pad - M), (0, 0)))

    out2d = pl.pallas_call(
        kernel,
        out_shape=jax.ShapeDtypeStruct((M_pad, dmp), out_dtype),
        grid_spec=pltpu.PrefetchScalarGridSpec(
            num_scalar_prefetch=0,
            grid=grid,
            in_specs=in_specs,
            out_specs=out_specs,
            scratch_shapes=scratch_shapes,
        ),
        compiler_params=pltpu.CompilerParams(
            dimension_semantics=dim_sem,
            vmem_limit_bytes=int(budget),
        ),
    )(x2d, w1p, b1_2d, w2p, b2_2d)

    if M_pad != M or dmp != d_model:
        out2d = out2d[:M, :d_model]
    return out2d.reshape(B, S, d_model)


# -----------------------------------------------------------------------------
# Params / reference
# -----------------------------------------------------------------------------
def init_params(key, d_model, d_ff, dtype=jnp.float32):
    """Deterministic init mimicking nn.Linear (uniform +/- 1/sqrt(fan_in)).
    Weights returned as (in_features, out_features)."""
    k1, k2, k3, k4 = jax.random.split(key, 4)
    lim1 = 1.0 / (d_model ** 0.5)
    lim2 = 1.0 / (d_ff ** 0.5)
    w1 = jax.random.uniform(k1, (d_model, d_ff), dtype, -lim1, lim1)
    b1 = jax.random.uniform(k2, (d_ff,), dtype, -lim1, lim1)
    w2 = jax.random.uniform(k3, (d_ff, d_model), dtype, -lim2, lim2)
    b2 = jax.random.uniform(k4, (d_model,), dtype, -lim2, lim2)
    return w1, b1, w2, b2


def _ref_ffn(x, w1, b1, w2, b2):
    xf = x.reshape(-1, x.shape[-1]).astype(jnp.float32)
    h = xf @ w1.astype(jnp.float32) + b1.astype(jnp.float32)
    y = _gelu_tanh(h) @ w2.astype(jnp.float32) + b2.astype(jnp.float32)
    return y.reshape(x.shape).astype(x.dtype)


if __name__ == "__main__":
    key = jax.random.PRNGKey(0)
    kx, kp = jax.random.split(key)

    # 1) Small smoke shape (resident-weights path; feature axes padded to 128).
    B, S, d_model, d_ff = 2, 8, 32, 64
    x = jax.random.normal(kx, (B, S, d_model), dtype=jnp.float32)
    w1, b1, w2, b2 = init_params(kp, d_model, d_ff)
    out = jax.block_until_ready(pointwise_ffn(x, w1, b1, w2, b2))
    y_ref = _ref_ffn(x, w1, b1, w2, b2)
    assert out.shape == (B, S, d_model)
    assert jnp.allclose(out, y_ref, atol=1e-5, rtol=1e-5)

    # 2) Larger shape (M=640): resident weights, minimal-padding row tiling
    #    (single 640-row tile on 1-TC chips, two balanced 320-row tiles on v7x).
    B2, S2, dm2, dff2 = 4, 160, 128, 1024
    kx2, kp2 = jax.random.split(jax.random.PRNGKey(1))
    x2 = jax.random.normal(kx2, (B2, S2, dm2), dtype=jnp.float32)
    p2 = init_params(kp2, dm2, dff2)
    y2_ref = _ref_ffn(x2, *p2)

    out2 = jax.block_until_ready(pointwise_ffn(x2, *p2))
    assert out2.shape == (B2, S2, dm2)
    assert jnp.allclose(out2, y2_ref, atol=1e-4, rtol=1e-4)

    # 3) Streamed d_ff-slab path (multi-step reduction, b2-seeded accumulator).
    out2s = jax.block_until_ready(
        pointwise_ffn(x2, *p2, force_streamed=True, tf_max=256))
    assert jnp.allclose(out2s, y2_ref, atol=1e-4, rtol=1e-4)

    # 4) Optional bf16 MXU-operand path (f32 accumulation); loose tolerance
    #    versus the f32 reference.
    out2b = jax.block_until_ready(
        pointwise_ffn(x2, *p2, use_bf16_operands=True))
    assert jnp.allclose(out2b, y2_ref, atol=5e-2, rtol=5e-2)

    print("KERNEL_OK")
</pallas_src>

<mosaic_0001>
module attributes {stable_mosaic.version = 11 : i64} {
  func.func @ffn_resident_kernel(%arg0: i32, %arg1: memref<16x128xf32, #tpu.memory_space<vmem>>, %arg2: memref<128x128xf32, #tpu.memory_space<vmem>>, %arg3: memref<1x128xf32, #tpu.memory_space<vmem>>, %arg4: memref<128x128xf32, #tpu.memory_space<vmem>>, %arg5: memref<1x128xf32, #tpu.memory_space<vmem>>, %arg6: memref<16x128xf32, #tpu.memory_space<vmem>>) attributes {dimension_semantics = [#tpu.dimension_semantics<parallel>], iteration_bounds = array<i64: 1>, scalar_prefetch = 0 : i64, scratch_operands = 0 : i64, tpu.core_type = #tpu.core_type<tc>, window_params = [{transform_indices = @transform_0, window_bounds = array<i64: 16, 128>}, {pipeline_mode = #tpu.pipeline_mode<synchronous>, transform_indices = @transform_1, window_bounds = array<i64: 128, 128>}, {pipeline_mode = #tpu.pipeline_mode<synchronous>, transform_indices = @transform_2, window_bounds = array<i64: 1, 128>}, {pipeline_mode = #tpu.pipeline_mode<synchronous>, transform_indices = @transform_3, window_bounds = array<i64: 128, 128>}, {pipeline_mode = #tpu.pipeline_mode<synchronous>, transform_indices = @transform_4, window_bounds = array<i64: 1, 128>}, {transform_indices = @transform_5, window_bounds = array<i64: 16, 128>}]} {
    %c0 = arith.constant 0 : index
    %c0_0 = arith.constant 0 : index
    %0 = vector.load %arg1[%c0, %c0_0] : memref<16x128xf32, #tpu.memory_space<vmem>>, vector<16x128xf32>
    %c0_1 = arith.constant 0 : index
    %c0_2 = arith.constant 0 : index
    %1 = vector.load %arg2[%c0_1, %c0_2] : memref<128x128xf32, #tpu.memory_space<vmem>>, vector<128x128xf32>
    %cst = arith.constant dense<0.000000e+00> : vector<16x128xf32>
    %2 = tpu.matmul %0, %1, %cst {dimension_numbers = #tpu.dot_dimension_numbers<[1], [0], [0], [1], [0, 0, 1, 1], [], []>} : vector<16x128xf32>, vector<128x128xf32>, vector<16x128xf32> -> vector<16x128xf32>
    %c0_3 = arith.constant 0 : index
    %c0_4 = arith.constant 0 : index
    %3 = vector.load %arg3[%c0_3, %c0_4] : memref<1x128xf32, #tpu.memory_space<vmem>>, vector<1x128xf32>
    %4 = vector.broadcast %3 : vector<1x128xf32> to vector<16x128xf32>
    %5 = arith.addf %2, %4 : vector<16x128xf32>
    %6 = arith.mulf %5, %5 : vector<16x128xf32>
    %cst_5 = arith.constant 5.000000e-01 : f32
    %7 = vector.broadcast %cst_5 : f32 to vector<16x128xf32>
    %8 = arith.mulf %7, %5 : vector<16x128xf32>
    %cst_6 = arith.constant 0.797884583 : f32
    %9 = vector.broadcast %cst_6 : f32 to vector<16x128xf32>
    %10 = arith.mulf %9, %5 : vector<16x128xf32>
    %cst_7 = arith.constant 4.471500e-02 : f32
    %11 = vector.broadcast %cst_7 : f32 to vector<16x128xf32>
    %12 = arith.mulf %11, %6 : vector<16x128xf32>
    %cst_8 = arith.constant 1.000000e+00 : f32
    %13 = vector.broadcast %cst_8 : f32 to vector<16x128xf32>
    %14 = arith.addf %13, %12 : vector<16x128xf32>
    %15 = arith.mulf %10, %14 : vector<16x128xf32>
    %16 = math.tanh %15 : vector<16x128xf32>
    %cst_9 = arith.constant 1.000000e+00 : f32
    %17 = vector.broadcast %cst_9 : f32 to vector<16x128xf32>
    %18 = arith.addf %17, %16 : vector<16x128xf32>
    %19 = arith.mulf %8, %18 : vector<16x128xf32>
    %c0_10 = arith.constant 0 : index
    %c0_11 = arith.constant 0 : index
    %20 = vector.load %arg4[%c0_10, %c0_11] : memref<128x128xf32, #tpu.memory_space<vmem>>, vector<128x128xf32>
    %cst_12 = arith.constant dense<0.000000e+00> : vector<16x128xf32>
    %21 = tpu.matmul %19, %20, %cst_12 {dimension_numbers = #tpu.dot_dimension_numbers<[1], [0], [0], [1], [0, 0, 1, 1], [], []>} : vector<16x128xf32>, vector<128x128xf32>, vector<16x128xf32> -> vector<16x128xf32>
    %c0_13 = arith.constant 0 : index
    %c0_14 = arith.constant 0 : index
    %22 = vector.load %arg5[%c0_13, %c0_14] : memref<1x128xf32, #tpu.memory_space<vmem>>, vector<1x128xf32>
    %23 = vector.broadcast %22 : vector<1x128xf32> to vector<16x128xf32>
    %24 = arith.addf %21, %23 : vector<16x128xf32>
    %c0_15 = arith.constant 0 : index
    %c0_16 = arith.constant 0 : index
    %25 = vector.load %arg6[%c0_15, %c0_16] : memref<16x128xf32, #tpu.memory_space<vmem>>, vector<16x128xf32>
    tpu.vector_store %arg6[%c0_15, %c0_16], %24 {strides = array<i32>} : memref<16x128xf32, #tpu.memory_space<vmem>>, vector<16x128xf32>,
    return
  }
  func.func @transform_0(%arg0: i32) -> (i32, i32) {
    %c0_i32 = arith.constant 0 : i32
    %c0_i32_0 = arith.constant 0 : i32
    return %arg0, %c0_i32 : i32, i32
  }
  func.func @transform_1(%arg0: i32) -> (i32, i32) {
    %c0_i32 = arith.constant 0 : i32
    %c0_i32_0 = arith.constant 0 : i32
    %c0_i32_1 = arith.constant 0 : i32
    return %c0_i32, %c0_i32_0 : i32, i32
  }
  func.func @transform_2(%arg0: i32) -> (i32, i32) {
    %c0_i32 = arith.constant 0 : i32
    %c0_i32_0 = arith.constant 0 : i32
    %c0_i32_1 = arith.constant 0 : i32
    return %c0_i32, %c0_i32_0 : i32, i32
  }
  func.func @transform_3(%arg0: i32) -> (i32, i32) {
    %c0_i32 = arith.constant 0 : i32
    %c0_i32_0 = arith.constant 0 : i32
    %c0_i32_1 = arith.constant 0 : i32
    return %c0_i32, %c0_i32_0 : i32, i32
  }
  func.func @transform_4(%arg0: i32) -> (i32, i32) {
    %c0_i32 = arith.constant 0 : i32
    %c0_i32_0 = arith.constant 0 : i32
    %c0_i32_1 = arith.constant 0 : i32
    return %c0_i32, %c0_i32_0 : i32, i32
  }
  func.func @transform_5(%arg0: i32) -> (i32, i32) {
    %c0_i32 = arith.constant 0 : i32
    %c0_i32_0 = arith.constant 0 : i32
    return %arg0, %c0_i32 : i32, i32
  }
}

</mosaic_0001>

<bundles_post_ra>
// kernel: tpu_custom_call.1
= control target key start
LH: loop header
LB: loop body
LE: loop exit
PB: predicated region body
PF: predicated region fallthrough
CT: control target
= control target key end

     0   :  { %10 = vsyncpa [#allocation3], 0  ;;  %s568_s0 = inlined_call_operand.hbm [shape: f32[16,128], index: 0, kind: input, shape index: {}]   ;;  %s569_s1 = inlined_call_operand.hbm [shape: f32[128,128], index: 1, kind: input, shape index: {}]   ;;  %s570_s2 = inlined_call_operand.vmem [shape: f32[1,128], index: 2, kind: input, shape index: {}]   ;;  %s571_s3 = inlined_call_operand.hbm [shape: f32[128,128], index: 3, kind: input, shape index: {}]   ;;  %s572_s4 = inlined_call_operand.vmem [shape: f32[1,128], index: 4, kind: input, shape index: {}]   ;;  %s573_s5 = inlined_call_operand.hbm [shape: f32[16,128], index: 5, kind: output, shape index: {}]  }
   0x1   :  { %11 = vsyncpa [#allocation6], 0 }
   0x2   :  { %12 = vsyncpa [#allocation4], 0  ;;  %s502_s18 = smov [#allocation5]   ;;  %s503_s20 = smov [#allocation2]  }
   0x3   :  { %s30_s19 = sshll.u32 %s502_s18, 4  ;;  %s18_s21 = sshll.u32 %s503_s20, 4  ;;  %s31_s19 = int_to_ptr.vmem [resolvable:$true] %s30_s19  ;;  %s19_s21 = int_to_ptr.vmem [resolvable:$true] %s18_s21 }
   0x4   :  { %s424_s22 = scalar_lea.vmem %s31_s19, 2048  ;;  %p429_p1 = scmp.lt.s32.totalorder %s31_s19, %s31_s19 }
   0x5   :  { %p425_p0 = scmp.ne.s32.totalorder %s31_s19, %s424_s22  ;;  %p430_p2 = scmp.lt.s32.totalorder %s424_s22, %s424_s22 }
   0x7   :  { %p431_p3 = por %p430_p2, %p429_p1 }
   0x9   :  { %p432_p4 = pnand %p431_p3, %p425_p0 }
   0xb   :  { %435 = shalt.err (!%p432_p4)
}
   0xc   :  { %s504_s23 = smov 128   ;;  %s505_s24 = smov 8  }
   0xd   :  { %36 = dma.hbm_to_vmem [thread:$0]  %s569_s1, 2048, %s31_s19, [#allocation6], %s504_s23, %s504_s23, %s505_s24  }
   0xe   :  { %s444_s27 = scalar_lea.vmem %s19_s21, 256  ;;  %p449_p6 = scmp.lt.s32.totalorder %s19_s21, %s19_s21 }
   0xf   :  { %p445_p5 = scmp.ne.s32.totalorder %s19_s21, %s444_s27  ;;  %p450_p7 = scmp.lt.s32.totalorder %s444_s27, %s444_s27 }
  0x11   :  { %p451_p8 = por %p450_p7, %p449_p6 }
  0x13   :  { %p452_p9 = pnand %p451_p8, %p445_p5 }
  0x15   :  { %455 = shalt.err (!%p452_p9)
}
  0x16   :  { %24 = dma.hbm_to_vmem [thread:$0]  %s568_s0, 256, %s19_s21, [#allocation3], %s504_s23, %s504_s23, %s505_s24  }
  0x17   :  { %s506_s30 = smov [#allocation7]  }
  0x18   :  { %s44_s6 = sshll.u32 %s506_s30, 4  ;;  %s45_s6 = int_to_ptr.vmem [resolvable:$true] %s44_s6 }
  0x19   :  { %s464_s7 = scalar_lea.vmem %s45_s6, 2048  ;;  %p469_p11 = scmp.lt.s32.totalorder %s45_s6, %s45_s6 }
  0x1a   :  { %p465_p10 = scmp.ne.s32.totalorder %s45_s6, %s464_s7  ;;  %p470_p12 = scmp.lt.s32.totalorder %s464_s7, %s464_s7 }
  0x1c   :  { %p471_p13 = por %p470_p12, %p469_p11 }
  0x1e   :  { %p472_p0 = pnand %p471_p13, %p465_p10 }
  0x20   :  { %475 = shalt.err (!%p472_p0)
}
  0x21   :  { %50 = dma.hbm_to_vmem [thread:$0]  %s571_s3, 2048, %s45_s6, [#allocation6], %s504_s23, %s504_s23, %s505_s24  }
  0x22   :  { %496 = dma.done.wait [#allocation3], 256  }
  0x23   :  { %497 = vsyncadd [#allocation3], 4294967040 }
  0x24   :  { %498 = dma.done.wait [#allocation6], 4096  }
  0x25   :  { %499 = vsyncadd [#allocation6], 4294963200  ;;  %v79_v0 = vld [vmem:[#allocation5 + $0x78] sm:$0xff]  ;;  %v78_v1 = vld [vmem:[#allocation5 + $0x70] sm:$0xff]  ;;  %s507_s10 = smov [#allocation8]  }
  0x26   :  { %336 = vmatprep.subr.mxu0 %v79_v0  ;;  %v77_v2 = vld [vmem:[#allocation5 + $0x68] sm:$0xff]  ;;  %v76_v3 = vld [vmem:[#allocation5 + $0x60] sm:$0xff]  ;;  %v62_v4 = vld [vmem:[#allocation2] sm:$0xff]  ;;  %s285_s11 = sshll.u32 %s507_s10, 4  ;;  %s286_s11 = int_to_ptr.vmem [resolvable:$true] %s285_s11 }
  0x27   :  { %337 = vmatpush3.msra.mxu0 %v79_v0  ;;  %v75_v5 = vld [vmem:[#allocation5 + $0x58] sm:$0xff]  ;;  %368 = vmatprep.mubr.f32.mxu0 %v62_v4  ;;  %v74_v6 = vld [vmem:[#allocation5 + $0x50] sm:$0xff]  ;;  %v73_v7 = vld [vmem:[#allocation5 + $0x48] sm:$0xff]  ;;  %s476_s12 = scalar_lea.vmem %s286_s11, 256  ;;  %p481_p2 = scmp.lt.s32.totalorder %s286_s11, %s286_s11 }
  0x28   :  { %338 = vmatprep.subr.mxu0 %v78_v1  ;;  %v72_v8 = vld [vmem:[#allocation5 + $0x40] sm:$0xff]  ;;  %v71_v9 = vld [vmem:[#allocation5 + $0x38] sm:$0xff]  ;;  %v70_v10 = vld [vmem:[#allocation5 + $0x30] sm:$0xff]  ;;  %p477_p1 = scmp.ne.s32.totalorder %s286_s11, %s476_s12  ;;  %p482_p3 = scmp.lt.s32.totalorder %s476_s12, %s476_s12 }
  0x29   :  { %339 = vmatpush3.msra.mxu0 %v78_v1  ;;  %v69_v11 = vld [vmem:[#allocation5 + $0x28] sm:$0xff]  ;;  %v68_v12 = vld [vmem:[#allocation5 + $0x20] sm:$0xff]  ;;  %v67_v13 = vld [vmem:[#allocation5 + $0x18] sm:$0xff] }
  0x2a   :  { %340 = vmatprep.subr.mxu0 %v77_v2  ;;  %v66_v14 = vld [vmem:[#allocation5 + $0x10] sm:$0xff]  ;;  %v65_v15 = vld [vmem:[#allocation5 + $0x8] sm:$0xff]  ;;  %v64_v16 = vld [vmem:[#allocation5] sm:$0xff]  ;;  %p483_p4 = por %p482_p3, %p481_p2 }
  0x2b   :  { %341 = vmatpush3.msra.mxu0 %v77_v2  ;;  %v63_v17 = vld [vmem:[#allocation2 + $0x8] sm:$0xff]  ;;  %v194_v19 = vld [vmem:[#allocation7 + $0x70] sm:$0xff]  ;;  %v193_v20 = vld [vmem:[#allocation7 + $0x68] sm:$0xff] }
  0x2c   :  { %342 = vmatprep.subr.mxu0 %v76_v3  ;;  %v195_v18 = vld [vmem:[#allocation7 + $0x78] sm:$0xff]  ;;  %v192_v21 = vld [vmem:[#allocation7 + $0x60] sm:$0xff]  ;;  %v190_v23 = vld [vmem:[#allocation7 + $0x50] sm:$0xff]  ;;  %p484_p5 = pnand %p483_p4, %p477_p1 }
  0x2d   :  { %343 = vmatpush3.msra.mxu0 %v76_v3  ;;  %371 = vmatprep.subr.mxu1 %v195_v18  ;;  %v191_v22 = vld [vmem:[#allocation7 + $0x58] sm:$0xff]  ;;  %v189_v24 = vld [vmem:[#allocation7 + $0x48] sm:$0xff]  ;;  %v188_v25 = vld [vmem:[#allocation7 + $0x40] sm:$0xff] }
  0x2e   :  { %344 = vmatprep.subr.mxu0 %v75_v5  ;;  %372 = vmatpush3.msra.mxu1 %v195_v18  ;;  %v187_v26 = vld [vmem:[#allocation7 + $0x38] sm:$0xff]  ;;  %v186_v27 = vld [vmem:[#allocation7 + $0x30] sm:$0xff]  ;;  %v185_v28 = vld [vmem:[#allocation7 + $0x28] sm:$0xff] }
  0x2f   :  { %345 = vmatpush3.msra.mxu0 %v75_v5  ;;  %373 = vmatprep.subr.mxu1 %v194_v19  ;;  %v184_v29 = vld [vmem:[#allocation7 + $0x20] sm:$0xff]  ;;  %v183_v30 = vld [vmem:[#allocation7 + $0x18] sm:$0xff]  ;;  %v182_v31 = vld [vmem:[#allocation7 + $0x10] sm:$0xff] }
  0x30   :  { %346 = vmatprep.subr.mxu0 %v74_v6  ;;  %374 = vmatpush3.msra.mxu1 %v194_v19  ;;  %v181_v32 = vld [vmem:[#allocation7 + $0x8] sm:$0xff]  ;;  %v180_v33 = vld [vmem:[#allocation7] sm:$0xff]  ;;  %v298_v34 = vld [vmem:[%s570_s2] ss:$0 sm:$0xff] }
  0x31   :  { %347 = vmatpush3.msra.mxu0 %v74_v6  ;;  %375 = vmatprep.subr.mxu1 %v193_v20  ;;  %v299_v57 = vld [vmem:[%s572_s4] ss:$0 sm:$0xff] }
  0x32   :  { %348 = vmatprep.subr.mxu0 %v73_v7  ;;  %376 = vmatpush3.msra.mxu1 %v193_v20 }
  0x33   :  { %349 = vmatpush3.msra.mxu0 %v73_v7  ;;  %377 = vmatprep.subr.mxu1 %v192_v21 }
  0x34   :  { %350 = vmatprep.subr.mxu0 %v72_v8  ;;  %378 = vmatpush3.msra.mxu1 %v192_v21 }
  0x35   :  { %351 = vmatpush3.msra.mxu0 %v72_v8  ;;  %379 = vmatprep.subr.mxu1 %v191_v22 }
  0x36   :  { %352 = vmatprep.subr.mxu0 %v71_v9  ;;  %380 = vmatpush3.msra.mxu1 %v191_v22 }
  0x37   :  { %353 = vmatpush3.msra.mxu0 %v71_v9  ;;  %381 = vmatprep.subr.mxu1 %v190_v23 }
  0x38   :  { %354 = vmatprep.subr.mxu0 %v70_v10  ;;  %382 = vmatpush3.msra.mxu1 %v190_v23 }
  0x39   :  { %355 = vmatpush3.msra.mxu0 %v70_v10  ;;  %383 = vmatprep.subr.mxu1 %v189_v24 }
  0x3a   :  { %356 = vmatprep.subr.mxu0 %v69_v11  ;;  %384 = vmatpush3.msra.mxu1 %v189_v24 }
  0x3b   :  { %357 = vmatpush3.msra.mxu0 %v69_v11  ;;  %385 = vmatprep.subr.mxu1 %v188_v25 }
  0x3c   :  { %358 = vmatprep.subr.mxu0 %v68_v12  ;;  %386 = vmatpush3.msra.mxu1 %v188_v25 }
  0x3d   :  { %359 = vmatpush3.msra.mxu0 %v68_v12  ;;  %387 = vmatprep.subr.mxu1 %v187_v26 }
  0x3e   :  { %360 = vmatprep.subr.mxu0 %v67_v13  ;;  %388 = vmatpush3.msra.mxu1 %v187_v26 }
  0x3f   :  { %361 = vmatpush3.msra.mxu0 %v67_v13  ;;  %389 = vmatprep.subr.mxu1 %v186_v27 }
  0x40   :  { %362 = vmatprep.subr.mxu0 %v66_v14  ;;  %390 = vmatpush3.msra.mxu1 %v186_v27 }
  0x41   :  { %363 = vmatpush3.msra.mxu0 %v66_v14  ;;  %391 = vmatprep.subr.mxu1 %v185_v28 }
  0x42   :  { %364 = vmatprep.subr.mxu0 %v65_v15  ;;  %392 = vmatpush3.msra.mxu1 %v185_v28 }
  0x43   :  { %365 = vmatpush3.msra.mxu0 %v65_v15  ;;  %393 = vmatprep.subr.mxu1 %v184_v29 }
  0x44   :  { %366 = vmatprep.subr.mxu0 %v64_v16  ;;  %394 = vmatpush3.msra.mxu1 %v184_v29 }
  0x45   :  { %367 = vmatpush3.msra.mxu0 %v64_v16  ;;  %395 = vmatprep.subr.mxu1 %v183_v30 }
  0x46   :  { %369 = vmatmul.mubr.f32.vlgmr.msra.gmra.mxu0 %v63_v17  ;;  %396 = vmatpush3.msra.mxu1 %v183_v30 }
  0x47   :  { %397 = vmatprep.subr.mxu1 %v182_v31 }
  0x48   :  { %398 = vmatpush3.msra.mxu1 %v182_v31 }
  0x49   :  { %399 = vmatprep.subr.mxu1 %v181_v32 }
  0x4a   :  { %400 = vmatpush3.msra.mxu1 %v181_v32 }
  0x4b   :  { %401 = vmatprep.subr.mxu1 %v180_v33 }
  0x4c   :  { %402 = vmatpush3.msra.mxu1 %v180_v33 }
 0x106   :  { %v370_v35 = vpop.f32.mrf.mxu0 }
 0x107   :  { %v159_v36 = vadd.f32 %v370_v35, %v298_v34 }
 0x108   :  { %v153_v37 = vpop.f32.mrf.mxu0 }
 0x109   :  { %v163_v38 = vmul.f32 %v159_v36, %v159_v36  ;;  %v154_v39 = vadd.f32 %v298_v34, %v153_v37  ;;  %v167_v42 = vmul.f32 0.7978846, %v159_v36  ;;  %v165_v54 = vmul.f32 0.5, %v159_v36 }
 0x10b   :  { %v169_v40 = vmul.f32 0.044715, %v163_v38  ;;  %v162_v41 = vmul.f32 %v154_v39, %v154_v39  ;;  %v166_v46 = vmul.f32 0.7978846, %v154_v39  ;;  %v164_v52 = vmul.f32 0.5, %v154_v39 }
 0x10d   :  { %v171_v43 = vadd.f32 1.0, %v169_v40  ;;  %v168_v44 = vmul.f32 0.044715, %v162_v41 }
 0x10f   :  { %v173_v45 = vmul.f32 %v171_v43, %v167_v42  ;;  %v170_v47 = vadd.f32 1.0, %v168_v44 }
 0x111   :  { %412 = vtanh.f32 %v173_v45  ;;  %v172_v48 = vmul.f32 %v170_v47, %v166_v46 }
 0x113   :  { %414 = vtanh.f32 %v172_v48 }
 0x11e   :  { %v413_v49 = vpop.eup %412 }
 0x11f   :  { %v177_v51 = vadd.f32 1.0, %v413_v49 }
 0x120   :  { %v415_v50 = vpop.eup %414 }
 0x121   :  { %v176_v53 = vadd.f32 1.0, %v415_v50  ;;  %v179_v56 = vmul.f32 %v177_v51, %v165_v54 }
 0x123   :  { %v178_v55 = vmul.f32 %v176_v53, %v164_v52 }
 0x125   :  { %403 = vmatprep.mubr.f32.mxu1 %v178_v55 }
 0x126   :  { %404 = vmatmul.mubr.f32.vlgmr.msra.gmra.mxu1 %v179_v56 }
 0x1e6   :  { %v405_v58 = vpop.f32.mrf.mxu1 }
 0x1e7   :  { %v275_v59 = vadd.f32 %v405_v58, %v299_v57 }
 0x1e8   :  { %v269_v60 = vpop.f32.mrf.mxu1 }
 0x1e9   :  { %279 = vst [vmem:[#allocation8 + $0x8] sm:$0xff] %v275_v59  ;;  %v270_v61 = vadd.f32 %v299_v57, %v269_v60 }
 0x1eb   :  { %278 = vst [vmem:[#allocation8] sm:$0xff] %v270_v61 }
 0x1ec   :  { %487 = shalt.err (!%p484_p5)
}
 0x1ed   :  { %291 = dma.vmem_to_hbm [thread:$0]  %s286_s11, 256, %s573_s5, [#allocation4], %s504_s23, %s504_s23, %s505_s24  }
 0x1ee   :  { %500 = dma.done.wait [#allocation4], 256  }
 0x1ef   :  { %501 = vsyncadd [#allocation4], 4294967040 }
 0x1f0   :  { %295 = vsyncpa [#allocation3], 1 }
 0x1f1   :  { %296 = vsyncpa [#allocation6], 1 }
 0x1f2   :  { %297 = vsyncpa [#allocation4], 1 }

</bundles_post_ra>
